<compile_context>
chip_gen: v7x
topology: tpu7x:2x2x1
jax: 0.10.0
libtpu: 0.0.40
codegen_flags: <defaults>
</compile_context>

<pallas_src>
import jax
import jax.numpy as jnp
from jax.experimental import pallas as pl
from jax.experimental.pallas import tpu as pltpu

# --- physical constants (match torch module __init__) -----------------------
GRAVITY = 9.8
MASSCART = 1.0
MASSPOLE = 0.1
TOTAL_MASS = MASSPOLE + MASSCART
LENGTH = 0.5
POLEMASS_LENGTH = MASSPOLE * LENGTH
FORCE_MAG = 10.0
TAU = 0.02

# precomputed reciprocals / ratios (strength-reduce constant divides)
INV_TOTAL_MASS = 1.0 / TOTAL_MASS
MASSPOLE_RATIO = MASSPOLE / TOTAL_MASS                     # masspole / total_mass
POLEMASS_LENGTH_OVER_MASS = POLEMASS_LENGTH / TOTAL_MASS   # polemass_length / total_mass

# State layout along the leading axis of the stacked (4, B, N) tensor.
_IX, _IXD, _ITH, _ITHD = 0, 1, 2, 3


def _euler_step(x, x_dot, theta, theta_dot, action):
    """One CartPole Euler step (pure elementwise math on VPU/EUP)."""
    force = jnp.clip(action, -FORCE_MAG, FORCE_MAG)
    costheta = jnp.cos(theta)
    sintheta = jnp.sin(theta)
    temp = (force + POLEMASS_LENGTH * theta_dot * theta_dot * sintheta) * INV_TOTAL_MASS
    denom = LENGTH * (4.0 / 3.0 - MASSPOLE_RATIO * costheta * costheta)
    # exact reciprocal (approx=True would exceed the 1e-5 test tolerance)
    thetaacc = (GRAVITY * sintheta - costheta * temp) * pl.reciprocal(denom, approx=False)
    xacc = temp - POLEMASS_LENGTH_OVER_MASS * thetaacc * costheta
    return (x + TAU * x_dot,
            x_dot + TAU * xacc,
            theta + TAU * theta_dot,
            theta_dot + TAU * thetaacc)


# ---------------------------------------------------------------------------
# Single-step kernel (matches the torch module's forward exactly)
# ---------------------------------------------------------------------------
def _cartpole_step_kernel(state_ref, act_ref, out_ref):
    x_n, xd_n, th_n, thd_n = _euler_step(
        state_ref[_IX], state_ref[_IXD], state_ref[_ITH], state_ref[_ITHD],
        act_ref[...])
    out_ref[_IX] = x_n
    out_ref[_IXD] = xd_n
    out_ref[_ITH] = th_n
    out_ref[_ITHD] = thd_n


def cartpole_step(state, action):
    """state: dict of (B, N) f32 arrays; action: (B, N) f32. One Euler step."""
    stacked = jnp.stack(
        [state['x'], state['x_dot'], state['theta'], state['theta_dot']], axis=0)
    out = pl.pallas_call(
        _cartpole_step_kernel,
        out_shape=jax.ShapeDtypeStruct(stacked.shape, stacked.dtype),
        in_specs=[pl.BlockSpec(memory_space=pltpu.MemorySpace.VMEM),
                  pl.BlockSpec(memory_space=pltpu.MemorySpace.VMEM)],
        out_specs=pl.BlockSpec(memory_space=pltpu.MemorySpace.VMEM),
        input_output_aliases={0: 0},   # donate stacked state buffer to output
    )(stacked, action)
    return dict(x=out[_IX], x_dot=out[_IXD], theta=out[_ITH], theta_dot=out[_ITHD])


# ---------------------------------------------------------------------------
# Fused rollout kernel: T Euler steps in one pallas_call, state resident in
# VMEM (the output block), only the (1, B, N) action tile streamed per step.
# ---------------------------------------------------------------------------
def _cartpole_rollout_kernel(state_ref, act_ref, out_ref):
    @pl.when(pl.program_id(0) == 0)
    def _():
        out_ref[...] = state_ref[...]        # seed resident state at t == 0

    x_n, xd_n, th_n, thd_n = _euler_step(
        out_ref[_IX], out_ref[_IXD], out_ref[_ITH], out_ref[_ITHD],
        act_ref[0])
    out_ref[_IX] = x_n
    out_ref[_IXD] = xd_n
    out_ref[_ITH] = th_n
    out_ref[_ITHD] = thd_n


def cartpole_rollout(state, actions):
    """actions: (T, B, N). Returns the state after T fused Euler steps."""
    stacked = jnp.stack(
        [state['x'], state['x_dot'], state['theta'], state['theta_dot']], axis=0)
    T, B, N = actions.shape
    # NOTE(v7x): for large B, additionally tile the sublane (B) axis with
    # >=512-row blocks, mark it "parallel" in dimension_semantics and size
    # tiles against 64 MiB VMEM; at B=8 there is nothing to split.
    out = pl.pallas_call(
        _cartpole_rollout_kernel,
        out_shape=jax.ShapeDtypeStruct(stacked.shape, stacked.dtype),
        grid=(T,),
        in_specs=[pl.BlockSpec((4, B, N), lambda t: (0, 0, 0)),   # resident state
                  pl.BlockSpec((1, B, N), lambda t: (t, 0, 0))],  # streamed action
        out_specs=pl.BlockSpec((4, B, N), lambda t: (0, 0, 0)),   # carry in VMEM
        input_output_aliases={0: 0},
        compiler_params=pltpu.CompilerParams(
            dimension_semantics=("arbitrary",)),  # time axis carries state
    )(stacked, actions)
    return dict(x=out[_IX], x_dot=out[_IXD], theta=out[_ITH], theta_dot=out[_ITHD])


# ---------------------------------------------------------------------------
# Pure-JAX reference mirroring the torch module's math (with real divides)
# ---------------------------------------------------------------------------
def cartpole_step_ref(state, action):
    x, x_dot, theta, theta_dot = (state['x'], state['x_dot'],
                                  state['theta'], state['theta_dot'])
    force = jnp.clip(action, -FORCE_MAG, FORCE_MAG)
    costheta = jnp.cos(theta)
    sintheta = jnp.sin(theta)
    temp = (force + POLEMASS_LENGTH * theta_dot ** 2 * sintheta) / TOTAL_MASS
    thetaacc = (GRAVITY * sintheta - costheta * temp) / (
        LENGTH * (4.0 / 3.0 - MASSPOLE * costheta ** 2 / TOTAL_MASS))
    xacc = temp - POLEMASS_LENGTH * thetaacc * costheta / TOTAL_MASS
    return dict(
        x=x + TAU * x_dot,
        x_dot=x_dot + TAU * xacc,
        theta=theta + TAU * theta_dot,
        theta_dot=theta_dot + TAU * thetaacc,
    )


if __name__ == "__main__":
    B, N, T = 8, 128, 16   # batch of cartpole states; lane-dense (8,128) layout
    key = jax.random.PRNGKey(0)
    kx, kxd, kth, kthd, ka = jax.random.split(key, 5)
    state = dict(
        x=jax.random.uniform(kx, (B, N), jnp.float32, -2.0, 2.0),
        x_dot=jax.random.uniform(kxd, (B, N), jnp.float32, -1.0, 1.0),
        theta=jax.random.uniform(kth, (B, N), jnp.float32, -0.2, 0.2),
        theta_dot=jax.random.uniform(kthd, (B, N), jnp.float32, -1.0, 1.0),
    )
    actions = jax.random.uniform(ka, (T, B, N), jnp.float32, -15.0, 15.0)

    # --- single step (matches the torch forward) ---------------------------
    out1 = cartpole_step(state, actions[0])
    jax.block_until_ready(out1)
    ref1 = cartpole_step_ref(state, actions[0])
    for k in ("x", "x_dot", "theta", "theta_dot"):
        assert jnp.allclose(out1[k], ref1[k], atol=1e-5, rtol=1e-5), f"step:{k}"

    # --- fused T-step rollout (state resident in VMEM) ----------------------
    outT = cartpole_rollout(state, actions)
    jax.block_until_ready(outT)
    refT = state
    for t in range(T):
        refT = cartpole_step_ref(refT, actions[t])
    for k in ("x", "x_dot", "theta", "theta_dot"):
        assert jnp.allclose(outT[k], refT[k], atol=1e-4, rtol=1e-4), f"rollout:{k}"

    print("KERNEL_OK")
</pallas_src>

<mosaic_0001>
module attributes {stable_mosaic.version = 11 : i64} {
  func.func @_cartpole_step_kernel(%arg0: memref<4x8x128xf32, #tpu.memory_space<vmem>>, %arg1: memref<8x128xf32, #tpu.memory_space<vmem>>, %arg2: memref<4x8x128xf32, #tpu.memory_space<vmem>>) attributes {dimension_semantics = [], scalar_prefetch = 0 : i64, scratch_operands = 0 : i64, tpu.core_type = #tpu.core_type<tc>} {
    %c0 = arith.constant 0 : index
    %c0_0 = arith.constant 0 : index
    %c0_1 = arith.constant 0 : index
    %0 = vector.load %arg0[%c0, %c0_0, %c0_1] : memref<4x8x128xf32, #tpu.memory_space<vmem>>, vector<1x8x128xf32>
    %1 = vector.shape_cast %0 : vector<1x8x128xf32> to vector<8x128xf32>
    %c1 = arith.constant 1 : index
    %c0_2 = arith.constant 0 : index
    %c0_3 = arith.constant 0 : index
    %2 = vector.load %arg0[%c1, %c0_2, %c0_3] : memref<4x8x128xf32, #tpu.memory_space<vmem>>, vector<1x8x128xf32>
    %3 = vector.shape_cast %2 : vector<1x8x128xf32> to vector<8x128xf32>
    %c2 = arith.constant 2 : index
    %c0_4 = arith.constant 0 : index
    %c0_5 = arith.constant 0 : index
    %4 = vector.load %arg0[%c2, %c0_4, %c0_5] : memref<4x8x128xf32, #tpu.memory_space<vmem>>, vector<1x8x128xf32>
    %5 = vector.shape_cast %4 : vector<1x8x128xf32> to vector<8x128xf32>
    %c3 = arith.constant 3 : index
    %c0_6 = arith.constant 0 : index
    %c0_7 = arith.constant 0 : index
    %6 = vector.load %arg0[%c3, %c0_6, %c0_7] : memref<4x8x128xf32, #tpu.memory_space<vmem>>, vector<1x8x128xf32>
    %7 = vector.shape_cast %6 : vector<1x8x128xf32> to vector<8x128xf32>
    %c0_8 = arith.constant 0 : index
    %c0_9 = arith.constant 0 : index
    %8 = vector.load %arg1[%c0_8, %c0_9] : memref<8x128xf32, #tpu.memory_space<vmem>>, vector<8x128xf32>
    %cst = arith.constant -1.000000e+01 : f32
    %cst_10 = arith.constant 1.000000e+01 : f32
    %9 = vector.broadcast %cst : f32 to vector<8x128xf32>
    %10 = arith.maximumf %9, %8 : vector<8x128xf32>
    %11 = vector.broadcast %cst_10 : f32 to vector<8x128xf32>
    %12 = arith.minimumf %11, %10 : vector<8x128xf32>
    %13 = math.cos %5 : vector<8x128xf32>
    %14 = math.sin %5 : vector<8x128xf32>
    %cst_11 = arith.constant 5.000000e-02 : f32
    %15 = vector.broadcast %cst_11 : f32 to vector<8x128xf32>
    %16 = arith.mulf %15, %7 : vector<8x128xf32>
    %17 = arith.mulf %16, %7 : vector<8x128xf32>
    %18 = arith.mulf %17, %14 : vector<8x128xf32>
    %19 = arith.addf %12, %18 : vector<8x128xf32>
    %cst_12 = arith.constant 0.909090936 : f32
    %20 = vector.broadcast %cst_12 : f32 to vector<8x128xf32>
    %21 = arith.mulf %19, %20 : vector<8x128xf32>
    %cst_13 = arith.constant 0.0909090936 : f32
    %22 = vector.broadcast %cst_13 : f32 to vector<8x128xf32>
    %23 = arith.mulf %22, %13 : vector<8x128xf32>
    %24 = arith.mulf %23, %13 : vector<8x128xf32>
    %cst_14 = arith.constant 1.33333337 : f32
    %25 = vector.broadcast %cst_14 : f32 to vector<8x128xf32>
    %26 = arith.subf %25, %24 : vector<8x128xf32>
    %cst_15 = arith.constant 5.000000e-01 : f32
    %27 = vector.broadcast %cst_15 : f32 to vector<8x128xf32>
    %28 = arith.mulf %27, %26 : vector<8x128xf32>
    %cst_16 = arith.constant 9.800000e+00 : f32
    %29 = vector.broadcast %cst_16 : f32 to vector<8x128xf32>
    %30 = arith.mulf %29, %14 : vector<8x128xf32>
    %31 = arith.mulf %13, %21 : vector<8x128xf32>
    %32 = arith.subf %30, %31 : vector<8x128xf32>
    %33 = tpu.reciprocal %28 : vector<8x128xf32> -> vector<8x128xf32>
    %34 = arith.mulf %32, %33 : vector<8x128xf32>
    %cst_17 = arith.constant 0.0454545468 : f32
    %35 = vector.broadcast %cst_17 : f32 to vector<8x128xf32>
    %36 = arith.mulf %35, %34 : vector<8x128xf32>
    %37 = arith.mulf %36, %13 : vector<8x128xf32>
    %38 = arith.subf %21, %37 : vector<8x128xf32>
    %cst_18 = arith.constant 2.000000e-02 : f32
    %39 = vector.broadcast %cst_18 : f32 to vector<8x128xf32>
    %40 = arith.mulf %39, %3 : vector<8x128xf32>
    %41 = arith.addf %1, %40 : vector<8x128xf32>
    %cst_19 = arith.constant 2.000000e-02 : f32
    %42 = vector.broadcast %cst_19 : f32 to vector<8x128xf32>
    %43 = arith.mulf %42, %38 : vector<8x128xf32>
    %44 = arith.addf %3, %43 : vector<8x128xf32>
    %cst_20 = arith.constant 2.000000e-02 : f32
    %45 = vector.broadcast %cst_20 : f32 to vector<8x128xf32>
    %46 = arith.mulf %45, %7 : vector<8x128xf32>
    %47 = arith.addf %5, %46 : vector<8x128xf32>
    %cst_21 = arith.constant 2.000000e-02 : f32
    %48 = vector.broadcast %cst_21 : f32 to vector<8x128xf32>
    %49 = arith.mulf %48, %34 : vector<8x128xf32>
    %50 = arith.addf %7, %49 : vector<8x128xf32>
    %c0_22 = arith.constant 0 : index
    %c0_23 = arith.constant 0 : index
    %c0_24 = arith.constant 0 : index
    %51 = vector.load %arg2[%c0_22, %c0_23, %c0_24] : memref<4x8x128xf32, #tpu.memory_space<vmem>>, vector<1x8x128xf32>
    %52 = vector.shape_cast %51 : vector<1x8x128xf32> to vector<8x128xf32>
    %53 = vector.shape_cast %41 : vector<8x128xf32> to vector<1x8x128xf32>
    tpu.vector_store %arg2[%c0_22, %c0_23, %c0_24], %53 {strides = array<i32>} : memref<4x8x128xf32, #tpu.memory_space<vmem>>, vector<1x8x128xf32>,
    %c1_25 = arith.constant 1 : index
    %c0_26 = arith.constant 0 : index
    %c0_27 = arith.constant 0 : index
    %54 = vector.load %arg2[%c1_25, %c0_26, %c0_27] : memref<4x8x128xf32, #tpu.memory_space<vmem>>, vector<1x8x128xf32>
    %55 = vector.shape_cast %54 : vector<1x8x128xf32> to vector<8x128xf32>
    %56 = vector.shape_cast %44 : vector<8x128xf32> to vector<1x8x128xf32>
    tpu.vector_store %arg2[%c1_25, %c0_26, %c0_27], %56 {strides = array<i32>} : memref<4x8x128xf32, #tpu.memory_space<vmem>>, vector<1x8x128xf32>,
    %c2_28 = arith.constant 2 : index
    %c0_29 = arith.constant 0 : index
    %c0_30 = arith.constant 0 : index
    %57 = vector.load %arg2[%c2_28, %c0_29, %c0_30] : memref<4x8x128xf32, #tpu.memory_space<vmem>>, vector<1x8x128xf32>
    %58 = vector.shape_cast %57 : vector<1x8x128xf32> to vector<8x128xf32>
    %59 = vector.shape_cast %47 : vector<8x128xf32> to vector<1x8x128xf32>
    tpu.vector_store %arg2[%c2_28, %c0_29, %c0_30], %59 {strides = array<i32>} : memref<4x8x128xf32, #tpu.memory_space<vmem>>, vector<1x8x128xf32>,
    %c3_31 = arith.constant 3 : index
    %c0_32 = arith.constant 0 : index
    %c0_33 = arith.constant 0 : index
    %60 = vector.load %arg2[%c3_31, %c0_32, %c0_33] : memref<4x8x128xf32, #tpu.memory_space<vmem>>, vector<1x8x128xf32>
    %61 = vector.shape_cast %60 : vector<1x8x128xf32> to vector<8x128xf32>
    %62 = vector.shape_cast %50 : vector<8x128xf32> to vector<1x8x128xf32>
    tpu.vector_store %arg2[%c3_31, %c0_32, %c0_33], %62 {strides = array<i32>} : memref<4x8x128xf32, #tpu.memory_space<vmem>>, vector<1x8x128xf32>,
    return
  }
}

</mosaic_0001>

<bundles_post_ra>
// kernel: tpu_custom_call.1
= control target key start
LH: loop header
LB: loop body
LE: loop exit
PB: predicated region body
PF: predicated region fallthrough
CT: control target
= control target key end

     0   :  { %7 = vsyncpa [#allocation3], 0  ;;  %s459_s0 = inlined_call_operand.hbm [shape: f32[4,8,128], index: 0, kind: input, shape index: {}, may-alias: {0,2}]   ;;  %s460_s1 = inlined_call_operand.vmem [shape: f32[8,128], index: 1, kind: input, shape index: {}]   ;;  %s461_s2 = inlined_call_operand.hbm [shape: f32[4,8,128], index: 2, kind: output, shape index: {}, may-alias: {0,2}]  }
   0x1   :  { %8 = vsyncpa [#allocation4], 0  ;;  %s369_s9 = smov [#allocation2]   ;;  %s321_s13 = scalar_lea.hbm %s459_s0, 512 }
   0x2   :  { %s14_s10 = sshll.u32 %s369_s9, 4  ;;  %p322_p0 = scmp.ne.s32.totalorder %s459_s0, %s321_s13  ;;  %s15_s10 = int_to_ptr.vmem [resolvable:$true] %s14_s10 }
   0x3   :  { %p325_p1 = scmp.lt.u32.totalorder %s321_s13, %s459_s0 }
   0x5   :  { %p327_p2 = pnand %p325_p1, %p322_p0 }
   0x7   :  { %330 = shalt.err (!%p327_p2)
}
   0x8   :  { %s331_s18 = scalar_lea.vmem %s15_s10, 512  ;;  %p336_p4 = scmp.lt.s32.totalorder %s15_s10, %s15_s10 }
   0x9   :  { %p332_p3 = scmp.ne.s32.totalorder %s15_s10, %s331_s18  ;;  %p337_p5 = scmp.lt.s32.totalorder %s331_s18, %s331_s18 }
   0xb   :  { %p338_p6 = por %p337_p5, %p336_p4 }
   0xd   :  { %p339_p7 = pnand %p338_p6, %p332_p3 }
   0xf   :  { %342 = shalt.err (!%p339_p7)
}
  0x10   :  { %s370_s19 = smov 128   ;;  %s371_s20 = smov 8  }
  0x11   :  { %20 = dma.hbm_to_vmem [thread:$0]  %s459_s0, 512, %s15_s10, [#allocation3], %s370_s19, %s370_s19, %s371_s20  }
  0x12   :  { %365 = dma.done.wait [#allocation3], 512  }
  0x13   :  { %366 = vsyncadd [#allocation3], 4294966784  ;;  %v26_v0 = vld [vmem:[#allocation2] sm:$0xff]  ;;  %v409_v1 = vld [vmem:[#allocation2 + $0x8] sm:$0xff]  ;;  %v372_v19 = vmov 683565275  }
  0x14   :  { %v411_v2 = vld [vmem:[#allocation2 + $0x10] sm:$0xff]  ;;  %v260_v3 = vmul.f32 0.02, %v409_v1  ;;  %v414_v4 = vld [vmem:[#allocation2 + $0x18] sm:$0xff]  ;;  %v373_v21 = vmov 2475754826  }
  0x15   :  { %v39_v5 = vand.u32 2139095040, %v411_v2  ;;  %v264_v7 = vmul.f32 0.02, %v414_v4  ;;  %v36_v9 = vand.u32 2147483647, %v411_v2  ;;  %vm38_vm7 = vcmp.lt.s32.totalorder %v411_v2, 0 }
  0x16   :  { %v261_v6 = vadd.f32 %v260_v3, %v26_v0  ;;  %v374_v23 = vmov 2131351028   ;;  %v375_v25 = vmov 2102212464   ;;  %v376_v27 = vmov 920167782  }
  0x17   :  { %v40_v8 = vshrl.u32 %v39_v5, 23  ;;  %v265_v10 = vadd.f32 %v264_v7, %v411_v2  ;;  %v43_v13 = vand.u32 8388607, %v36_v9  ;;  %v377_v34 = vmov 1326507024  }
  0x18   :  { %268 = vst [vmem:[#allocation5] sm:$0xff] %v261_v6  ;;  %vm37_vm8 = vcmp.le.f32.partialorder %v36_v9, 0.7853982  ;;  %vm128_vm15 = vweird.f32 %v411_v2 }
  0x19   :  { %v293_v11 = vadd.s32 4294967169, %v40_v8  ;;  %272 = vst [vmem:[#allocation5 + $0x10] sm:$0xff] %v265_v10  ;;  %v44_v16 = vor.u32 8388608, %v43_v13 }
  0x1b   :  { %v46_v12 = vadd.s32 1, %v293_v11  ;;  %v84_v36 = vshll.u32 %v44_v16, 8 }
  0x1d   :  { %vm47_vm0 = vcmp.gt.s32.totalorder %v46_v12, 0 }
  0x1e   :  { %v48_v14 = vsel %vm47_vm0, %v46_v12, 0 }
  0x1f   :  { %v50_v15 = vand.u32 31, %v48_v14  ;;  %v49_v17 = vshrl.u32 %v48_v14, 5 }
  0x21   :  { %v51_v18 = vsub.s32 32, %v50_v15  ;;  %v53_v20 = vshll.u32 %v372_v19, %v50_v15  ;;  %v56_v22 = vshll.u32 %v373_v21, %v50_v15  ;;  %v59_v24 = vshll.u32 %v374_v23, %v50_v15 }
  0x22   :  { %v62_v26 = vshll.u32 %v375_v25, %v50_v15  ;;  %v65_v28 = vshll.u32 %v376_v27, %v50_v15  ;;  %vm68_vm1 = vcmp.lt.s32.totalorder %v49_v17, 1  ;;  %vm71_vm2 = vcmp.lt.s32.totalorder %v49_v17, 4 }
  0x23   :  { %v52_v29 = vshrl.u32 %v372_v19, %v51_v18  ;;  %v54_v30 = vshrl.u32 %v373_v21, %v51_v18  ;;  %v57_v31 = vshrl.u32 %v374_v23, %v51_v18  ;;  %v60_v32 = vshrl.u32 %v375_v25, %v51_v18 }
  0x24   :  { %v63_v33 = vshrl.u32 %v376_v27, %v51_v18  ;;  %v66_v35 = vshrl.u32 %v377_v34, %v51_v18  ;;  %vm69_vm3 = vcmp.lt.s32.totalorder %v49_v17, 2  ;;  %vm70_vm4 = vcmp.lt.s32.totalorder %v49_v17, 3 }
  0x25   :  { %v55_v37 = vor.u32 %v54_v30, %v53_v20  ;;  %v58_v38 = vor.u32 %v57_v31, %v56_v22  ;;  %v61_v39 = vor.u32 %v60_v32, %v59_v24  ;;  %v243_v32 = vmul.f32 0.05, %v414_v4 }
  0x26   :  { %v64_v40 = vor.u32 %v63_v33, %v62_v26  ;;  %v67_v41 = vor.u32 %v66_v35, %v65_v28 }
  0x27   :  { %v72_v42 = vsel %vm68_vm1, %v52_v29, %v55_v37  ;;  %v73_v43 = vsel %vm71_vm2, %v61_v39, 2102212464  ;;  %v76_v44 = vsel %vm68_vm1, %v55_v37, %v58_v38  ;;  %v80_v45 = vsel %vm68_vm1, %v58_v38, %v61_v39 }
  0x28   :  { %v74_v46 = vsel %vm70_vm4, %v58_v38, %v73_v43  ;;  %v77_v47 = vsel %vm71_vm2, %v64_v40, 920167782  ;;  %v81_v48 = vsel %vm71_vm2, %v67_v41, 1326507024 }
  0x29   :  { %v78_v49 = vsel %vm70_vm4, %v61_v39, %v77_v47  ;;  %v82_v50 = vsel %vm70_vm4, %v64_v40, %v81_v48  ;;  %v75_v51 = vsel %vm69_vm3, %v72_v42, %v74_v46  ;;  %v244_v39 = vmul.f32 %v243_v32, %v414_v4 }
  0x2a   :  { %v79_v52 = vsel %vm69_vm3, %v76_v44, %v78_v49  ;;  %v83_v53 = vsel %vm69_vm3, %v80_v45, %v82_v50  ;;  %v91_v58 = vmul.u32 %v84_v36, %v75_v51 }
  0x2b   :  { %v422_v54 = vmul.u32.u64.low %v84_v36, %v83_v53  ;;  %v423_v55 = vmul.u32.u64.high %v84_v36, %v83_v53, %v422_v54  ;;  %v425_v56 = vmul.u32.u64.low %v84_v36, %v79_v52  ;;  %v426_v57 = vmul.u32.u64.high %v84_v36, %v79_v52, %v425_v56  ;;  %v33_v36 = vld [vmem:[%s460_s1] sm:$0xff]  ;;  %s378_s1 = smov [#allocation5]  }
  0x2c   :  { %v292_v44 = vclamps-f32 %v33_v36, 10.0  ;;  %s280_s24 = sshll.u32 %s378_s1, 4  ;;  %s281_s24 = int_to_ptr.vmem [resolvable:$true] %s280_s24 }
  0x2d   :  { %vm93_vm5 = vc.u32 %v423_v55, %v425_v56  ;;  %v94_v59 = vadd.s32 1, %v426_v57  ;;  %v92_v10 = vadd.s32 %v425_v56, %v423_v55  ;;  %s343_s25 = scalar_lea.vmem %s281_s24, 512  ;;  %p348_p9 = scmp.lt.s32.totalorder %s281_s24, %s281_s24 }
  0x2e   :  { %p344_p8 = scmp.ne.s32.totalorder %s281_s24, %s343_s25  ;;  %p349_p10 = scmp.lt.s32.totalorder %s343_s25, %s343_s25 }
  0x2f   :  { %v95_v60 = vsel %vm93_vm5, %v94_v59, %v426_v57 }
  0x30   :  { %v96_v61 = vadd.s32 %v95_v60, %v91_v58  ;;  %p350_p11 = por %p349_p10, %p348_p9 }
  0x32   :  { %v97_v62 = vadd.s32 536870912, %v96_v61  ;;  %p351_p12 = pnand %p350_p11, %p344_p8 }
  0x34   :  { %v98_v63 = vshrl.u32 %v97_v62, 30 }
  0x36   :  { %v99_v0 = vshll.u32 %v98_v63, 30  ;;  %v122_v23 = vsub.s32 4, %v98_v63 }
  0x38   :  { %v100_v3 = vsub.s32 %v96_v61, %v99_v0  ;;  %v123_v26 = vsel %vm38_vm7, %v122_v23, %v98_v63 }
  0x39   :  { %v125_v28 = vsel %vm37_vm8, 0, %v123_v26 }
  0x3a   :  { %v102_v5 = vsub.s32 0, %v100_v3  ;;  %v232_v29 = vadd.s32 3, %v125_v28  ;;  %v129_v30 = vand.u32 3, %v125_v28 }
  0x3c   :  { %v294_v6 = vmin.u32 %v102_v5, %v100_v3  ;;  %v233_v31 = vand.u32 3, %v232_v29  ;;  %vm134_vm9 = vcmp.eq.s32.totalorder %v129_v30, 2  ;;  %vm131_vm11 = vcmp.eq.s32.totalorder %v129_v30, 0 }
  0x3d   :  { %vm130_vm13 = vcmp.lt.s32.totalorder %v129_v30, 2 }
  0x3e   :  { %v104_v7 = vclz %v294_v6  ;;  %vm238_vm10 = vcmp.eq.s32.totalorder %v233_v31, 2  ;;  %vm235_vm12 = vcmp.eq.s32.totalorder %v233_v31, 0  ;;  %vm234_vm14 = vcmp.lt.s32.totalorder %v233_v31, 2 }
  0x40   :  { %v295_v8 = vadd.s32 4294967294, %v104_v7 }
  0x42   :  { %vm296_vm6 = vcmp.lt.s32.totalorder %v295_v8, 0 }
  0x43   :  { %v107_v11 = vsel %vm296_vm6, 0, %v295_v8 }
  0x44   :  { %v108_v12 = vsub.s32 32, %v107_v11  ;;  %v109_v13 = vshll.u32 %v100_v3, %v107_v11  ;;  %v112_v14 = vsub.s32 4294967266, %v107_v11 }
  0x46   :  { %v110_v15 = vshrl.u32 %v92_v10, %v108_v12  ;;  %v113_v16 = vadd.s32 127, %v112_v14 }
  0x48   :  { %v111_v17 = vor.u32 %v110_v15, %v109_v13  ;;  %v114_v18 = vshll.u32 %v113_v16, 23 }
  0x4a   :  { %v115_v19 = vor.u32 4788187, %v114_v18  ;;  %v118_v20 = vcvt.s32.f32 %v111_v17 }
  0x4c   :  { %v116_v21 = vand.u32 2147483647, %v115_v19 }
  0x4e   :  { %v119_v22 = vmul.f32 %v118_v20, %v116_v21 }
  0x50   :  { %v120_v24 = vxor.u32 2147483648, %v119_v22 }
  0x52   :  { %v121_v25 = vsel %vm38_vm7, %v120_v24, %v119_v22 }
  0x53   :  { %v124_v27 = vsel %vm37_vm8, %v411_v2, %v121_v25 }
  0x54   :  { %315 = vcosq.f32 %v124_v27 }
  0x55   :  { %317 = vsinq.f32 %v124_v27 }
  0x5e   :  { %v316_v33 = vpop.eup %315 }
  0x5f   :  { %v318_v34 = vpop.eup %317  ;;  %v135_v35 = vxor.u32 2147483648, %v316_v33 }
  0x60   :  { %v132_v9 = vxor.u32 2147483648, %v318_v34 }
  0x61   :  { %v136_v37 = vsel %vm134_vm9, %v135_v35, %v318_v34  ;;  %v240_v38 = vsel %vm238_vm10, %v135_v35, %v318_v34 }
  0x62   :  { %v133_v40 = vsel %vm131_vm11, %v316_v33, %v132_v9  ;;  %v237_v41 = vsel %vm235_vm12, %v316_v33, %v132_v9 }
  0x63   :  { %v137_v42 = vsel %vm130_vm13, %v133_v40, %v136_v37  ;;  %v241_v43 = vsel %vm234_vm14, %v237_v41, %v240_v38 }
  0x64   :  { %v138_v45 = vsel %vm128_vm15, nan, %v137_v42  ;;  %v242_v46 = vsel %vm128_vm15, nan, %v241_v43 }
  0x65   :  { %v245_v47 = vmul.f32 %v244_v39, %v242_v46  ;;  %v248_v48 = vmul.f32 0.09090909, %v138_v45  ;;  %v252_v2 = vmul.f32 9.8, %v242_v46 }
  0x67   :  { %v249_v49 = vmul.f32 %v248_v48, %v138_v45  ;;  %v246_v50 = vadd.f32 %v292_v44, %v245_v47 }
  0x69   :  { %v250_v51 = vsub.f32 1.3333334, %v249_v49  ;;  %v247_v53 = vmul.f32 0.90909094, %v246_v50 }
  0x6b   :  { %v251_v52 = vmul.f32 0.5, %v250_v51  ;;  %v253_v54 = vmul.f32 %v247_v53, %v138_v45 }
  0x6d   :  { %319 = vrcp.f32 %v251_v52  ;;  %v254_v55 = vsub.f32 %v252_v2, %v253_v54 }
  0x77   :  { %v320_v56 = vpop.eup %319 }
  0x78   :  { %v256_v57 = vmul.f32 %v320_v56, %v254_v55 }
  0x7a   :  { %v257_v58 = vmul.f32 0.045454547, %v256_v57  ;;  %v266_v59 = vmul.f32 0.02, %v256_v57 }
  0x7c   :  { %v258_v60 = vmul.f32 %v257_v58, %v138_v45  ;;  %v267_v61 = vadd.f32 %v266_v59, %v414_v4 }
  0x7e   :  { %v259_v62 = vsub.f32 %v247_v53, %v258_v60  ;;  %274 = vst [vmem:[#allocation5 + $0x18] sm:$0xff] %v267_v61 }
  0x80   :  { %v262_v63 = vmul.f32 0.02, %v259_v62 }
  0x82   :  { %v263_v0 = vadd.f32 %v262_v63, %v409_v1 }
  0x84   :  { %270 = vst [vmem:[#allocation5 + $0x8] sm:$0xff] %v263_v0 }
  0x85   :  { %354 = shalt.err (!%p351_p12)
}
  0x86   :  { %s355_s28 = scalar_lea.hbm %s461_s2, 512 }
  0x87   :  { %p356_p13 = scmp.ne.s32.totalorder %s461_s2, %s355_s28  ;;  %p359_p0 = scmp.lt.u32.totalorder %s355_s28, %s461_s2 }
  0x89   :  { %p361_p1 = pnand %p359_p0, %p356_p13 }
  0x8b   :  { %364 = shalt.err (!%p361_p1)
}
  0x8c   :  { %286 = dma.vmem_to_hbm [thread:$0]  %s281_s24, 512, %s461_s2, [#allocation4], %s370_s19, %s370_s19, %s371_s20  }
  0x8d   :  { %367 = dma.done.wait [#allocation4], 512  }
  0x8e   :  { %368 = vsyncadd [#allocation4], 4294966784 }
  0x8f   :  { %290 = vsyncpa [#allocation3], 1 }
  0x90   :  { %291 = vsyncpa [#allocation4], 1 }

</bundles_post_ra>
